<compile_context>
chip_gen: v7x
topology: tpu7x:2x2x1
jax: 0.10.0
libtpu: 0.0.40
codegen_flags: <defaults>
</compile_context>

<pallas_src>
import functools

import jax
import jax.numpy as jnp
from jax.experimental import pallas as pl
from jax.experimental.pallas import tpu as pltpu

LANE = 128
SUBLANE = 8


def _round_up(n, m):
    return ((n + m - 1) // m) * m


def simplenet_kernel(x_ref, w1_ref, b1_ref, w2_ref, b2_ref, o_ref):
    # Layer 1 on the MXU: (TILE_B, IN) @ (IN, HID_PAD) -> (TILE_B, HID_PAD)
    h = jnp.dot(x_ref[...], w1_ref[...], preferred_element_type=jnp.float32)
    h = h + b1_ref[...]                      # (1, HID_PAD) broadcast; bias stays resident
    # LeakyReLU(negative_slope=0.1) on the VPU
    h = jnp.where(h > 0, h, 0.1 * h)
    # Dropout(0.3) -> identity (eval/inference mode)
    # Layer 2 (out_dim == 1): VPU multiply + XLU lane reduction instead of an
    # N=1 MXU matmul. w2 is a (1, HID_PAD) row, zero in the padded columns.
    y = jnp.sum(h * w2_ref[...], axis=-1, keepdims=True) + b2_ref[0, 0]   # (TILE_B, 1)
    # Sigmoid -> EUP slot; direct (tile, 1) store, no lane padding.
    o_ref[...] = jax.nn.sigmoid(y).astype(o_ref.dtype)


def prepare_params(w1, b1, w2, b2):
    """Pad weights/biases once at model-load time (not per forward call).
       w1: (input_dim, hidden); b1: (hidden,); w2: (hidden, 1); b2: (1,)."""
    in_dim, hidden = w1.shape
    out_dim = w2.shape[1]
    assert out_dim == 1, "kernel specializes the second Linear to a single output"
    hid_pad = _round_up(hidden, LANE)
    f32 = jnp.float32
    w1_p = jnp.zeros((in_dim, hid_pad), f32).at[:, :hidden].set(w1.astype(f32))
    b1_p = jnp.zeros((1, hid_pad), f32).at[0, :hidden].set(b1.astype(f32))
    w2_p = jnp.zeros((1, hid_pad), f32).at[0, :hidden].set(w2[:, 0].astype(f32))
    b2_p = b2.reshape(1, 1).astype(f32)
    return w1_p, b1_p, w2_p, b2_p


@functools.partial(jax.jit, static_argnames=("tile_b",))
def simplenet_forward(x, w1_p, b1_p, w2_p, b2_p, *, tile_b=8192):
    """x: (B, input_dim) streamed unpadded; padded params from prepare_params.
       Returns (B, 1)."""
    B, in_dim = x.shape
    hid_pad = w1_p.shape[1]

    # Largest sensible batch tile, multiple of 8 sublanes; Pallas masks the
    # ragged last block when B is not a multiple of `tile`.
    tile = min(_round_up(tile_b, SUBLANE), _round_up(B, SUBLANE))
    grid = (pl.cdiv(B, tile),)

    out = pl.pallas_call(
        simplenet_kernel,
        out_shape=jax.ShapeDtypeStruct((B, 1), jnp.float32),
        grid=grid,
        in_specs=[
            pl.BlockSpec((tile, in_dim), lambda i: (i, 0)),     # x: streamed per tile
            pl.BlockSpec((in_dim, hid_pad), lambda i: (0, 0)),  # w1: resident
            pl.BlockSpec((1, hid_pad), lambda i: (0, 0)),       # b1: resident
            pl.BlockSpec((1, hid_pad), lambda i: (0, 0)),       # w2 row: resident
            pl.BlockSpec(memory_space=pltpu.MemorySpace.SMEM),  # b2: scalar in SMEM
        ],
        out_specs=pl.BlockSpec((tile, 1), lambda i: (i, 0)),    # lane-1 output, no padding
        compiler_params=pltpu.CompilerParams(
            dimension_semantics=("parallel",),
            vmem_limit_bytes=32 * 1024 * 1024,   # safe on v5e/v6e/v7x; covers tile_b=8192
        ),
    )(x.astype(jnp.float32), w1_p, b1_p, w2_p, b2_p)
    return out


def _ref_forward(x, w1, b1, w2, b2):
    h = x @ w1 + b1
    h = jnp.where(h > 0, h, 0.1 * h)
    y = h @ w2 + b2
    return jax.nn.sigmoid(y)


if __name__ == "__main__":
    # SimpleNet(input_dim=32, hidden_dim=64, output_dim=1)
    input_dim, hidden_dim, output_dim = 32, 64, 1
    batch = 8

    key = jax.random.PRNGKey(0)
    kx, kw1, kb1, kw2, kb2 = jax.random.split(key, 5)

    x = jax.random.normal(kx, (batch, input_dim), dtype=jnp.float32)

    # Deterministic "PyTorch-like" uniform init, stored as (in, out) for the kernel.
    lim1 = 1.0 / (input_dim ** 0.5)
    w1 = jax.random.uniform(kw1, (input_dim, hidden_dim), jnp.float32, -lim1, lim1)
    b1 = jax.random.uniform(kb1, (hidden_dim,), jnp.float32, -lim1, lim1)
    lim2 = 1.0 / (hidden_dim ** 0.5)
    w2 = jax.random.uniform(kw2, (hidden_dim, output_dim), jnp.float32, -lim2, lim2)
    b2 = jax.random.uniform(kb2, (output_dim,), jnp.float32, -lim2, lim2)

    # One-time weight padding (hoisted out of the forward path).
    w1_p, b1_p, w2_p, b2_p = prepare_params(w1, b1, w2, b2)

    out = jax.block_until_ready(simplenet_forward(x, w1_p, b1_p, w2_p, b2_p))
    ref = _ref_forward(x, w1, b1, w2, b2)
    assert out.shape == (batch, output_dim)
    assert jnp.allclose(out, ref, atol=1e-5, rtol=1e-5), float(jnp.max(jnp.abs(out - ref)))

    # Exercise the multi-tile grid + ragged (masked OOB) last block path.
    batch2 = 520
    x2 = jax.random.normal(kx, (batch2, input_dim), dtype=jnp.float32)
    out2 = jax.block_until_ready(simplenet_forward(x2, w1_p, b1_p, w2_p, b2_p, tile_b=256))
    ref2 = _ref_forward(x2, w1, b1, w2, b2)
    assert out2.shape == (batch2, output_dim)
    assert jnp.allclose(out2, ref2, atol=1e-5, rtol=1e-5), float(jnp.max(jnp.abs(out2 - ref2)))

    print("KERNEL_OK")
</pallas_src>

<mosaic_0001>
module attributes {stable_mosaic.version = 11 : i64} {
  func.func @simplenet_kernel(%arg0: i32, %arg1: memref<8x32xf32, #tpu.memory_space<vmem>>, %arg2: memref<32x128xf32, #tpu.memory_space<vmem>>, %arg3: memref<1x128xf32, #tpu.memory_space<vmem>>, %arg4: memref<1x128xf32, #tpu.memory_space<vmem>>, %arg5: memref<1x1xf32, #tpu.memory_space<smem>>, %arg6: memref<8x1xf32, #tpu.memory_space<vmem>>) attributes {dimension_semantics = [#tpu.dimension_semantics<parallel>], iteration_bounds = array<i64: 1>, scalar_prefetch = 0 : i64, scratch_operands = 0 : i64, tpu.core_type = #tpu.core_type<tc>, window_params = [{transform_indices = @transform_0, window_bounds = array<i64: 8, 32>}, {pipeline_mode = #tpu.pipeline_mode<synchronous>, transform_indices = @transform_1, window_bounds = array<i64: 32, 128>}, {pipeline_mode = #tpu.pipeline_mode<synchronous>, transform_indices = @transform_2, window_bounds = array<i64: 1, 128>}, {pipeline_mode = #tpu.pipeline_mode<synchronous>, transform_indices = @transform_3, window_bounds = array<i64: 1, 128>}, {transform_indices = @transform_4, window_bounds = array<i64: 1, 1>}, {transform_indices = @transform_5, window_bounds = array<i64: 8, 1>}]} {
    %c0 = arith.constant 0 : index
    %c0_0 = arith.constant 0 : index
    %0 = vector.load %arg1[%c0, %c0_0] : memref<8x32xf32, #tpu.memory_space<vmem>>, vector<8x32xf32>
    %c0_1 = arith.constant 0 : index
    %c0_2 = arith.constant 0 : index
    %1 = vector.load %arg2[%c0_1, %c0_2] : memref<32x128xf32, #tpu.memory_space<vmem>>, vector<32x128xf32>
    %cst = arith.constant dense<0.000000e+00> : vector<8x128xf32>
    %2 = tpu.matmul %0, %1, %cst {dimension_numbers = #tpu.dot_dimension_numbers<[1], [0], [0], [1], [0, 0, 1, 1], [], []>} : vector<8x32xf32>, vector<32x128xf32>, vector<8x128xf32> -> vector<8x128xf32>
    %c0_3 = arith.constant 0 : index
    %c0_4 = arith.constant 0 : index
    %3 = vector.load %arg3[%c0_3, %c0_4] : memref<1x128xf32, #tpu.memory_space<vmem>>, vector<1x128xf32>
    %4 = vector.broadcast %3 : vector<1x128xf32> to vector<8x128xf32>
    %5 = arith.addf %2, %4 : vector<8x128xf32>
    %cst_5 = arith.constant 0.000000e+00 : f32
    %6 = vector.broadcast %cst_5 : f32 to vector<8x128xf32>
    %7 = arith.cmpf ogt, %5, %6 : vector<8x128xf32>
    %cst_6 = arith.constant 1.000000e-01 : f32
    %8 = vector.broadcast %cst_6 : f32 to vector<8x128xf32>
    %9 = arith.mulf %8, %5 : vector<8x128xf32>
    %10 = arith.select %7, %5, %9 : vector<8x128xi1>, vector<8x128xf32>
    %c0_7 = arith.constant 0 : index
    %c0_8 = arith.constant 0 : index
    %11 = vector.load %arg4[%c0_7, %c0_8] : memref<1x128xf32, #tpu.memory_space<vmem>>, vector<1x128xf32>
    %12 = vector.broadcast %11 : vector<1x128xf32> to vector<8x128xf32>
    %13 = arith.mulf %10, %12 : vector<8x128xf32>
    %cst_9 = arith.constant dense<0.000000e+00> : vector<8xf32>
    %14 = vector.multi_reduction <add>, %13, %cst_9 [1] : vector<8x128xf32> to vector<8xf32>
    %15 = vector.shape_cast %14 : vector<8xf32> to vector<8x1xf32>
    %c0_10 = arith.constant 0 : index
    %c0_11 = arith.constant 0 : index
    %16 = memref.load %arg5[%c0_10, %c0_11] : memref<1x1xf32, #tpu.memory_space<smem>>
    %17 = vector.broadcast %16 : f32 to vector<8x1xf32>
    %18 = arith.addf %15, %17 : vector<8x1xf32>
    %19 = arith.negf %18 : vector<8x1xf32>
    %20 = math.exp %19 : vector<8x1xf32>
    %cst_12 = arith.constant 1.000000e+00 : f32
    %21 = vector.broadcast %cst_12 : f32 to vector<8x1xf32>
    %22 = arith.addf %21, %20 : vector<8x1xf32>
    %23 = arith.divf %21, %22 : vector<8x1xf32>
    %c0_13 = arith.constant 0 : index
    %c0_14 = arith.constant 0 : index
    %24 = vector.load %arg6[%c0_13, %c0_14] : memref<8x1xf32, #tpu.memory_space<vmem>>, vector<8x1xf32>
    tpu.vector_store %arg6[%c0_13, %c0_14], %23 {strides = array<i32>} : memref<8x1xf32, #tpu.memory_space<vmem>>, vector<8x1xf32>,
    return
  }
  func.func @transform_0(%arg0: i32) -> (i32, i32) {
    %c0_i32 = arith.constant 0 : i32
    %c0_i32_0 = arith.constant 0 : i32
    return %arg0, %c0_i32 : i32, i32
  }
  func.func @transform_1(%arg0: i32) -> (i32, i32) {
    %c0_i32 = arith.constant 0 : i32
    %c0_i32_0 = arith.constant 0 : i32
    %c0_i32_1 = arith.constant 0 : i32
    return %c0_i32, %c0_i32_0 : i32, i32
  }
  func.func @transform_2(%arg0: i32) -> (i32, i32) {
    %c0_i32 = arith.constant 0 : i32
    %c0_i32_0 = arith.constant 0 : i32
    %c0_i32_1 = arith.constant 0 : i32
    return %c0_i32, %c0_i32_0 : i32, i32
  }
  func.func @transform_3(%arg0: i32) -> (i32, i32) {
    %c0_i32 = arith.constant 0 : i32
    %c0_i32_0 = arith.constant 0 : i32
    %c0_i32_1 = arith.constant 0 : i32
    return %c0_i32, %c0_i32_0 : i32, i32
  }
  func.func @transform_4(%arg0: i32) -> (i32, i32) {
    %c0_i32 = arith.constant 0 : i32
    %c0_i32_0 = arith.constant 0 : i32
    %c0_i32_1 = arith.constant 0 : i32
    return %c0_i32, %c0_i32_0 : i32, i32
  }
  func.func @transform_5(%arg0: i32) -> (i32, i32) {
    %c0_i32 = arith.constant 0 : i32
    %c0_i32_0 = arith.constant 0 : i32
    return %arg0, %c0_i32 : i32, i32
  }
}

</mosaic_0001>

<bundles_post_ra>
// kernel: simplenet_forward.1
= control target key start
LH: loop header
LB: loop body
LE: loop exit
PB: predicated region body
PF: predicated region fallthrough
CT: control target
= control target key end

     0   :  { %11 = vsyncpa [#allocation4], 0  ;;  %s328_s0 = inlined_call_operand.hbm [shape: f32[8,32], index: 0, kind: input, shape index: {}]   ;;  %s329_s1 = inlined_call_operand.hbm [shape: f32[32,128], index: 1, kind: input, shape index: {}]   ;;  %s330_s2 = inlined_call_operand.vmem [shape: f32[1,128], index: 2, kind: input, shape index: {}]   ;;  %s331_s3 = inlined_call_operand.vmem [shape: f32[1,128], index: 3, kind: input, shape index: {}]   ;;  %s332_s4 = inlined_call_operand.<no memory space> [shape: f32[1,1], index: 4, kind: input, shape index: {}]   ;;  %s333_s5 = inlined_call_operand.vmem [shape: f32[8,1], index: 5, kind: output, shape index: {}]  }
   0x1   :  { %12 = vsyncpa [#allocation6], 0  ;;  %s248_s18 = smov [#allocation3]   ;;  %s249_s20 = smov [#allocation5]  }
   0x2   :  { %s19_s19 = sshll.u32 %s248_s18, 4  ;;  %s28_s21 = sshll.u32 %s249_s20, 4  ;;  %s20_s19 = int_to_ptr.vmem [resolvable:$true] %s19_s19  ;;  %s285_s21 = int_to_ptr.vmem [resolvable:$true] %s28_s21 }
   0x3   :  { %s200_s24 = scalar_lea.hbm %s328_s0, 128 }
   0x4   :  { %p201_p0 = scmp.ne.s32.totalorder %s328_s0, %s200_s24  ;;  %p204_p1 = scmp.lt.u32.totalorder %s200_s24, %s328_s0 }
   0x6   :  { %p206_p2 = pnand %p204_p1, %p201_p0 }
   0x8   :  { %209 = shalt.err (!%p206_p2)
}
   0x9   :  { %s210_s29 = scalar_lea.vmem %s20_s19, 128  ;;  %p215_p4 = scmp.lt.s32.totalorder %s20_s19, %s20_s19 }
   0xa   :  { %p211_p3 = scmp.ne.s32.totalorder %s20_s19, %s210_s29  ;;  %p216_p5 = scmp.lt.s32.totalorder %s210_s29, %s210_s29 }
   0xc   :  { %p217_p6 = por %p216_p5, %p215_p4 }
   0xe   :  { %p218_p7 = pnand %p217_p6, %p211_p3 }
  0x10   :  { %221 = shalt.err (!%p218_p7)
}
  0x11   :  { %22 = dma.hbm_to_vmem [thread:$0]  %s328_s0, 128, %s20_s19, [#allocation4]  }
  0x12   :  { %s222_s9 = scalar_lea.hbm %s329_s1, 512 }
  0x13   :  { %p223_p8 = scmp.ne.s32.totalorder %s329_s1, %s222_s9  ;;  %p226_p9 = scmp.lt.u32.totalorder %s222_s9, %s329_s1 }
  0x15   :  { %p228_p10 = pnand %p226_p9, %p223_p8 }
  0x17   :  { %231 = shalt.err (!%p228_p10)
}
  0x18   :  { %s232_s14 = scalar_lea.vmem %s285_s21, 512  ;;  %p237_p12 = scmp.lt.s32.totalorder %s285_s21, %s285_s21 }
  0x19   :  { %p233_p11 = scmp.ne.s32.totalorder %s285_s21, %s232_s14  ;;  %p238_p13 = scmp.lt.s32.totalorder %s232_s14, %s232_s14 }
  0x1b   :  { %p239_p0 = por %p238_p13, %p237_p12 }
  0x1d   :  { %p240_p1 = pnand %p239_p0, %p233_p11 }
  0x1f   :  { %243 = shalt.err (!%p240_p1)
}
  0x20   :  { %s250_s0 = smov 128   ;;  %s251_s15 = smov 8  }
  0x21   :  { %34 = dma.hbm_to_vmem [thread:$0]  %s329_s1, 512, %s285_s21, [#allocation6], %s250_s0, %s250_s0, %s251_s15  }
  0x22   :  { %244 = dma.done.wait [#allocation4], 128  }
  0x23   :  { %245 = vsyncadd [#allocation4], 4294967168 }
  0x24   :  { %246 = dma.done.wait [#allocation6], 512  }
  0x25   :  { %247 = vsyncadd [#allocation6], 4294966784  ;;  %v252_v0 = vmov 0.0|0.0   ;;  %vm253_vm0 = vmmov 0   ;;  %v254_v1 = vmov 0.0   ;;  %v48_v2 = vld [vmem:[#allocation5] sm:$0xff]  ;;  %v147_v17 = vstv %s332_s4 }
  0x26   :  { %183 = vmatprep.subr.bf16.mxu0 %v252_v0  ;;  %180 = vmatprep.mubr.msk.f32.mxu0 %vm253_vm0, %v254_v1  ;;  %v49_v3 = vld [vmem:[#allocation5 + $0x8] sm:$0xff]  ;;  %v50_v4 = vld [vmem:[#allocation5 + $0x10] sm:$0xff]  ;;  %v51_v6 = vld [vmem:[#allocation5 + $0x18] sm:$0xff]  ;;  %vm59_vm1 = vcmask 261120   ;;  %vm155_vm3 = vcmask 7168  }
  0x27   :  { %v184_v5 = vpack.c.bf16 %v49_v3, %v48_v2  ;;  %v187_v7 = vpack.c.bf16 %v51_v6, %v50_v4  ;;  %v47_v8 = vld [vmem:[#allocation3] sm:$0xff] }
  0x28   :  { %v163_v9 = vld [vmem:[%s330_s2] ss:$0 sm:$0xff] }
  0x29   :  { %185 = vmatpush3.bf16.msra.mxu0 %v184_v5  ;;  %v165_v14 = vld [vmem:[%s331_s3] ss:$0 sm:$0xff] }
  0x2a   :  { %186 = vmatprep.subr.bf16.mxu0 %v252_v0 }
  0x2d   :  { %188 = vmatpush3.bf16.msra.mxu0 %v187_v7 }
  0x30   :  { %181 = vmatmul.mubr.msk.f32.vlgmr.msra.gmra.mrb[0].mxu0 %vm59_vm1, %v47_v8 }
 0x103   :  { %v129_v10 = vpop.f32.mrb[0].mxu0 }
 0x104   :  { %v130_v11 = vadd.f32 %v163_v9, %v129_v10  ;;  %v182_v12 = vpop.f32.mrb[1].mxu0 }
 0x106   :  { %v134_v13 = vmul.f32 0.1, %v130_v11  ;;  %vm133_vm2 = vcmp.gt.f32.partialorder %v130_v11, 0.0 }
 0x108   :  { %v135_v15 = vsel %vm133_vm2, %v130_v11, %v134_v13 }
 0x109   :  { %v143_v16 = vmul.f32 %v165_v14, %v135_v15 }
 0x10b   :  { %144 = vadd.xlane.f32.xlu0 %v143_v16 }
 0x198   :  { %v145_v18 = vpop.xlane.xlu0 %144 }
 0x199   :  { %v148_v19 = vadd.f32 %v147_v17, %v145_v18 }
 0x19b   :  { %v166_v20 = vmul.f32 -1.442695, %v148_v19 }
 0x19d   :  { %196 = vpow2.f32 %v166_v20 }
 0x1a7   :  { %v197_v21 = vpop.eup %196 }
 0x1a8   :  { %v152_v22 = vadd.f32 1.0, %v197_v21 }
 0x1aa   :  { %198 = vrcp.f32 %v152_v22 }
 0x1b4   :  { %v199_v23 = vpop.eup %198 }
 0x1b5   :  { %156 = vst.msk [vmem:[%s333_s5] sm:$0xff] %vm155_vm3, %v199_v23 }
 0x1b6   :  { %161 = vsyncpa [#allocation4], 1 }
 0x1b7   :  { %162 = vsyncpa [#allocation6], 1 }

</bundles_post_ra>
